<compile_context>
chip_gen: v7x
topology: tpu7x:2x2x1
jax: 0.10.0
libtpu: 0.0.40
codegen_flags: <defaults>
</compile_context>

<pallas_src>
import math
from functools import partial

import jax
import jax.numpy as jnp
from jax import lax
from jax.experimental import pallas as pl
from jax.experimental.pallas import tpu as pltpu


def _vmem_capacity_bytes():
    """Physical VMEM per core; used to size tiles / vmem limit per chip generation."""
    try:
        return int(pltpu.get_tpu_info().vmem_capacity_bytes)
    except Exception:
        return 128 * 1024 * 1024  # v5e / v6e default


def _const_spec(shape):
    """BlockSpec for a grid-invariant (weight/bias) block.

    Single-buffered when the running JAX supports pipeline_mode so invariant weights are
    not duplicated by the default double-buffering (matters on v7x's 64 MiB VMEM).
    """
    index_map = lambda *_: (0,) * len(shape)
    try:
        return pl.BlockSpec(shape, index_map, pipeline_mode=pl.Buffered(1))
    except TypeError:
        return pl.BlockSpec(shape, index_map)


def _pick_tile(n, pref):
    """Largest tile <= pref that divides n (multiple of 8 when possible)."""
    if n <= pref:
        return n
    if n % pref == 0:
        return pref
    for t in range(pref - pref % 8, 7, -8):
        if n % t == 0:
            return t
    # TODO(synk): pad n up to a multiple of the preferred tile and mask instead.
    return n


def _qkv_proj_kernel(x_ref, w_ref, b_ref, q_ref, k_ref, v_ref):
    """Fused QKV projection for one (batch, row-tile): (ts, D) @ (D, 3D) + bias.

    Each of Q/K/V is cast to the output dtype immediately (no (ts, 3D) f32 slab stays
    live).  Q comes out pre-scaled: the 1/sqrt(hd) scale is folded into Wq/bq on host.
    """
    D = q_ref.shape[-1]
    x = x_ref[0]                                            # (ts, D) input dtype
    for i, dst in enumerate((q_ref, k_ref, v_ref)):
        w = w_ref[:, i * D:(i + 1) * D]                     # (D, D) static lane window
        b = b_ref[:, i * D:(i + 1) * D].astype(jnp.float32)
        dst[0] = (jnp.dot(x, w, preferred_element_type=jnp.float32) + b).astype(dst.dtype)


def _flash_attn_kernel(q_ref, k_ref, v_ref, wo_ref, bo_ref, o_ref,
                       m_sc, l_sc, acc_sc, *, heads):
    """One (batch, query-tile, kv-tile) step of online-softmax attention.

    q_ref: (1, tq, D) pre-scaled Q rows.  k_ref/v_ref: (1, tk, D) K/V rows of this kv
    tile.  Scratch m/l: (H, tq, 1) f32 running max / denom; acc_sc: (tq, D) f32
    unnormalized context where head h lives at lanes [h*hd, (h+1)*hd).
    """
    kv_step = pl.program_id(2)
    D = q_ref.shape[-1]
    hd = D // heads
    dt = q_ref.dtype

    @pl.when(kv_step == 0)
    def _():
        m_sc[...] = jnp.full(m_sc.shape, -jnp.inf, jnp.float32)
        l_sc[...] = jnp.zeros(l_sc.shape, jnp.float32)
        acc_sc[...] = jnp.zeros(acc_sc.shape, jnp.float32)

    q = q_ref[0]                                            # (tq, D) input dtype for MXU
    k = k_ref[0]                                            # (tk, D)
    v = v_ref[0]                                            # (tk, D)

    contract_last = (((1,), (1,)), ((), ()))                # QK^T without explicit .T
    for h in range(heads):                                  # unrolled; state lives in VMEM
        sl = slice(h * hd, (h + 1) * hd)
        s = lax.dot_general(q[:, sl], k[:, sl], contract_last,
                            preferred_element_type=jnp.float32)        # (tq, tk) f32
        m_prev = m_sc[h]                                                # (tq, 1)
        m_new = jnp.maximum(m_prev, jnp.max(s, axis=-1, keepdims=True))
        alpha = jnp.exp(m_prev - m_new)
        # TODO(synk): on v6e/v7x the exp could run in bf16 (EUP bf16) with l kept in f32.
        p = jnp.exp(s - m_new)                                          # (tq, tk) f32
        l_sc[h] = alpha * l_sc[h] + jnp.sum(p, axis=-1, keepdims=True)
        acc_sc[:, sl] = alpha * acc_sc[:, sl] + jnp.dot(
            p.astype(dt), v[:, sl], preferred_element_type=jnp.float32)
        m_sc[h] = m_new

    @pl.when(kv_step == pl.num_programs(2) - 1)
    def _():
        # Deferred per-head normalization on the small (tq, hd) slabs, then ONE
        # lane-dense (tq, D) @ (D, D) output projection.
        for h in range(heads):
            sl = slice(h * hd, (h + 1) * hd)
            acc_sc[:, sl] = acc_sc[:, sl] * pl.reciprocal(l_sc[h], approx=False)
        ctx = acc_sc[...].astype(dt)
        out = (jnp.dot(ctx, wo_ref[...], preferred_element_type=jnp.float32)
               + bo_ref[...].astype(jnp.float32))
        o_ref[0] = out.astype(o_ref.dtype)


def flash_mha_pallas(x, wqkv, bqkv, wo, bo, heads, *,
                     q_tile=None, kv_tile=512, proj_tile=256):
    B, S, D = x.shape
    hd = D // heads
    scale = 1.0 / math.sqrt(hd)
    dt = x.dtype
    itemsize = jnp.dtype(dt).itemsize

    # ---- host-side weight flattening (head-interleaved lane order h*hd + e) ----
    w_q = jnp.transpose(wqkv[0], (1, 0, 2)).reshape(D, D) * scale   # scale folded in
    w_k = jnp.transpose(wqkv[1], (1, 0, 2)).reshape(D, D)
    w_v = jnp.transpose(wqkv[2], (1, 0, 2)).reshape(D, D)
    w_qkv = jnp.concatenate([w_q, w_k, w_v], axis=1).astype(dt)     # (D, 3D)
    b_qkv = jnp.concatenate([bqkv[0].reshape(1, D) * scale,
                             bqkv[1].reshape(1, D),
                             bqkv[2].reshape(1, D)], axis=1)        # (1, 3D)
    w_out = wo.reshape(D, D).astype(dt)                             # (D, D)
    b_out = bo.reshape(1, D)                                        # (1, D)

    # ---- per-generation sizing: ~48 MiB limit on v7x, ~96 MiB on v5e/v6e ----
    vmem_cap = _vmem_capacity_bytes()
    vmem_limit = (vmem_cap * 3) // 4
    if q_tile is None:
        q_tile = 128 if vmem_cap <= 64 * 1024 * 1024 else 256

    # ---- kernel 1: QKV projection, computed once per token (hoisted out of q-tiles) ----
    ts = _pick_tile(S, proj_tile)
    row_spec = pl.BlockSpec((1, ts, D), lambda b, si: (b, si, 0))
    q, k, v = pl.pallas_call(
        _qkv_proj_kernel,
        out_shape=(jax.ShapeDtypeStruct((B, S, D), dt),) * 3,
        grid=(B, S // ts),
        in_specs=[
            pl.BlockSpec((1, ts, D), lambda b, si: (b, si, 0)),     # x rows (read once)
            _const_spec((D, 3 * D)),                                # [Wq*scale | Wk | Wv]
            _const_spec((1, 3 * D)),                                # [bq*scale | bk | bv]
        ],
        out_specs=[row_spec, row_spec, row_spec],
        compiler_params=pltpu.CompilerParams(
            dimension_semantics=("parallel", "parallel"),
            vmem_limit_bytes=vmem_limit,
        ),
        cost_estimate=pl.CostEstimate(
            flops=6 * B * S * D * D,
            transcendentals=0,
            bytes_accessed=(4 * B * S * D + 3 * D * D + 3 * D) * itemsize,
        ),
    )(x, w_qkv, b_qkv)

    # ---- kernel 2: blocked-KV online-softmax attention + fused output projection ----
    tq = _pick_tile(S, q_tile)
    tk = _pick_tile(S, kv_tile)
    n_q = S // tq
    # Keep >= 2 grid points on the parallel axes so both v7x TensorCores stay busy.
    if B == 1 and n_q == 1 and S >= 16 and (S // 2) % 8 == 0:
        tq = S // 2
        n_q = 2
    n_kv = S // tk

    kernel = partial(_flash_attn_kernel, heads=heads)
    return pl.pallas_call(
        kernel,
        out_shape=jax.ShapeDtypeStruct((B, S, D), dt),
        grid=(B, n_q, n_kv),
        in_specs=[
            pl.BlockSpec((1, tq, D), lambda b, qi, kv: (b, qi, 0)),  # Q (pre-scaled)
            pl.BlockSpec((1, tk, D), lambda b, qi, kv: (b, kv, 0)),  # K tile
            pl.BlockSpec((1, tk, D), lambda b, qi, kv: (b, kv, 0)),  # V tile
            _const_spec((D, D)),                                     # Wout
            _const_spec((1, D)),                                     # bout
        ],
        out_specs=pl.BlockSpec((1, tq, D), lambda b, qi, kv: (b, qi, 0)),
        scratch_shapes=[
            pltpu.VMEM((heads, tq, 1), jnp.float32),   # running max m (per head)
            pltpu.VMEM((heads, tq, 1), jnp.float32),   # running denom l (per head)
            pltpu.VMEM((tq, D), jnp.float32),          # unnormalized context slab
        ],
        compiler_params=pltpu.CompilerParams(
            dimension_semantics=("parallel", "parallel", "arbitrary"),
            vmem_limit_bytes=vmem_limit,
        ),
        cost_estimate=pl.CostEstimate(
            flops=4 * B * S * S * D + 2 * B * S * D * D,
            transcendentals=B * heads * S * S,
            bytes_accessed=(B * S * D * (2 + 2 * n_q) + D * D + D) * itemsize,
        ),
    )(q, k, v, w_out, b_out)


def flash_mha_reference(x, wqkv, bqkv, wo, bo, heads):
    B, S, D = x.shape
    hd = D // heads
    scale = 1.0 / math.sqrt(hd)
    q = jnp.einsum("bsd,hde->bhse", x, wqkv[0]) + bqkv[0].reshape(1, heads, 1, hd)
    k = jnp.einsum("bsd,hde->bhse", x, wqkv[1]) + bqkv[1].reshape(1, heads, 1, hd)
    v = jnp.einsum("bsd,hde->bhse", x, wqkv[2]) + bqkv[2].reshape(1, heads, 1, hd)
    s = jnp.einsum("bhqe,bhke->bhqk", q, k) * scale
    p = jax.nn.softmax(s, axis=-1)
    ctx = jnp.einsum("bhqk,bhke->bhqe", p, v)
    out = jnp.einsum("bhse,hed->bsd", ctx, wo) + bo.reshape(1, 1, D)
    return out


if __name__ == "__main__":
    # Small, module-consistent shapes: Attention(dim=64, heads=8) on (B=2, S=8, D=64).
    B, S, D, H = 2, 8, 64, 8
    hd = D // H

    key = jax.random.PRNGKey(0)
    kx, kw, kbq, kwo, kbo = jax.random.split(key, 5)

    x = jax.random.normal(kx, (B, S, D), dtype=jnp.float32)
    # Deterministic synthetic parameters (no checkpoint loading).
    wqkv = jax.random.normal(kw, (3, H, D, hd), dtype=jnp.float32) * 0.05
    bqkv = jax.random.normal(kbq, (3, H, 1, hd), dtype=jnp.float32) * 0.02
    wo = jax.random.normal(kwo, (H, hd, D), dtype=jnp.float32) * 0.05
    bo = jax.random.normal(kbo, (1, D), dtype=jnp.float32) * 0.02

    out = flash_mha_pallas(x, wqkv, bqkv, wo, bo, H)
    out = jax.block_until_ready(out)

    ref = flash_mha_reference(x, wqkv, bqkv, wo, bo, H)
    assert out.shape == (B, S, D)
    assert jnp.allclose(out, ref, atol=1e-3, rtol=1e-3), (
        f"max abs err {jnp.max(jnp.abs(out - ref))}"
    )
    print("KERNEL_OK")
</pallas_src>

<mosaic_0001>
module attributes {stable_mosaic.version = 11 : i64} {
  func.func @_qkv_proj_kernel(%arg0: i32, %arg1: i32, %arg2: memref<1x8x64xf32, #tpu.memory_space<vmem>>, %arg3: memref<64x192xf32, #tpu.memory_space<vmem>>, %arg4: memref<1x192xf32, #tpu.memory_space<vmem>>, %arg5: memref<1x8x64xf32, #tpu.memory_space<vmem>>, %arg6: memref<1x8x64xf32, #tpu.memory_space<vmem>>, %arg7: memref<1x8x64xf32, #tpu.memory_space<vmem>>) attributes {dimension_semantics = [#tpu.dimension_semantics<parallel>, #tpu.dimension_semantics<parallel>], iteration_bounds = array<i64: 2, 1>, scalar_prefetch = 0 : i64, scratch_operands = 0 : i64, tpu.core_type = #tpu.core_type<tc>, window_params = [{transform_indices = @transform_0, window_bounds = array<i64: 1, 8, 64>}, {pipeline_mode = #tpu.pipeline_mode<synchronous>, transform_indices = @transform_1, window_bounds = array<i64: 64, 192>}, {pipeline_mode = #tpu.pipeline_mode<synchronous>, transform_indices = @transform_2, window_bounds = array<i64: 1, 192>}, {transform_indices = @transform_3, window_bounds = array<i64: 1, 8, 64>}, {transform_indices = @transform_4, window_bounds = array<i64: 1, 8, 64>}, {transform_indices = @transform_5, window_bounds = array<i64: 1, 8, 64>}]} {
    %c0 = arith.constant 0 : index
    %c0_0 = arith.constant 0 : index
    %c0_1 = arith.constant 0 : index
    %0 = vector.load %arg2[%c0, %c0_0, %c0_1] : memref<1x8x64xf32, #tpu.memory_space<vmem>>, vector<1x8x64xf32>
    %1 = vector.shape_cast %0 : vector<1x8x64xf32> to vector<8x64xf32>
    %c0_2 = arith.constant 0 : index
    %c0_3 = arith.constant 0 : index
    %2 = vector.load %arg3[%c0_2, %c0_3] : memref<64x192xf32, #tpu.memory_space<vmem>>, vector<64x64xf32>
    %c0_4 = arith.constant 0 : index
    %c0_5 = arith.constant 0 : index
    %3 = vector.load %arg4[%c0_4, %c0_5] : memref<1x192xf32, #tpu.memory_space<vmem>>, vector<1x64xf32>
    %cst = arith.constant dense<0.000000e+00> : vector<8x64xf32>
    %4 = tpu.matmul %1, %2, %cst {dimension_numbers = #tpu.dot_dimension_numbers<[1], [0], [0], [1], [0, 0, 1, 1], [], []>} : vector<8x64xf32>, vector<64x64xf32>, vector<8x64xf32> -> vector<8x64xf32>
    %5 = vector.broadcast %3 : vector<1x64xf32> to vector<8x64xf32>
    %6 = arith.addf %4, %5 : vector<8x64xf32>
    %c0_6 = arith.constant 0 : index
    %c0_7 = arith.constant 0 : index
    %c0_8 = arith.constant 0 : index
    %7 = vector.load %arg5[%c0_6, %c0_7, %c0_8] : memref<1x8x64xf32, #tpu.memory_space<vmem>>, vector<1x8x64xf32>
    %8 = vector.shape_cast %7 : vector<1x8x64xf32> to vector<8x64xf32>
    %9 = vector.shape_cast %6 : vector<8x64xf32> to vector<1x8x64xf32>
    tpu.vector_store %arg5[%c0_6, %c0_7, %c0_8], %9 {strides = array<i32>} : memref<1x8x64xf32, #tpu.memory_space<vmem>>, vector<1x8x64xf32>,
    %c0_9 = arith.constant 0 : index
    %c64 = arith.constant 64 : index
    %10 = vector.load %arg3[%c0_9, %c64] : memref<64x192xf32, #tpu.memory_space<vmem>>, vector<64x64xf32>
    %c0_10 = arith.constant 0 : index
    %c64_11 = arith.constant 64 : index
    %11 = vector.load %arg4[%c0_10, %c64_11] : memref<1x192xf32, #tpu.memory_space<vmem>>, vector<1x64xf32>
    %cst_12 = arith.constant dense<0.000000e+00> : vector<8x64xf32>
    %12 = tpu.matmul %1, %10, %cst_12 {dimension_numbers = #tpu.dot_dimension_numbers<[1], [0], [0], [1], [0, 0, 1, 1], [], []>} : vector<8x64xf32>, vector<64x64xf32>, vector<8x64xf32> -> vector<8x64xf32>
    %13 = vector.broadcast %11 : vector<1x64xf32> to vector<8x64xf32>
    %14 = arith.addf %12, %13 : vector<8x64xf32>
    %c0_13 = arith.constant 0 : index
    %c0_14 = arith.constant 0 : index
    %c0_15 = arith.constant 0 : index
    %15 = vector.load %arg6[%c0_13, %c0_14, %c0_15] : memref<1x8x64xf32, #tpu.memory_space<vmem>>, vector<1x8x64xf32>
    %16 = vector.shape_cast %15 : vector<1x8x64xf32> to vector<8x64xf32>
    %17 = vector.shape_cast %14 : vector<8x64xf32> to vector<1x8x64xf32>
    tpu.vector_store %arg6[%c0_13, %c0_14, %c0_15], %17 {strides = array<i32>} : memref<1x8x64xf32, #tpu.memory_space<vmem>>, vector<1x8x64xf32>,
    %c0_16 = arith.constant 0 : index
    %c128 = arith.constant 128 : index
    %18 = vector.load %arg3[%c0_16, %c128] : memref<64x192xf32, #tpu.memory_space<vmem>>, vector<64x64xf32>
    %c0_17 = arith.constant 0 : index
    %c128_18 = arith.constant 128 : index
    %19 = vector.load %arg4[%c0_17, %c128_18] : memref<1x192xf32, #tpu.memory_space<vmem>>, vector<1x64xf32>
    %cst_19 = arith.constant dense<0.000000e+00> : vector<8x64xf32>
    %20 = tpu.matmul %1, %18, %cst_19 {dimension_numbers = #tpu.dot_dimension_numbers<[1], [0], [0], [1], [0, 0, 1, 1], [], []>} : vector<8x64xf32>, vector<64x64xf32>, vector<8x64xf32> -> vector<8x64xf32>
    %21 = vector.broadcast %19 : vector<1x64xf32> to vector<8x64xf32>
    %22 = arith.addf %20, %21 : vector<8x64xf32>
    %c0_20 = arith.constant 0 : index
    %c0_21 = arith.constant 0 : index
    %c0_22 = arith.constant 0 : index
    %23 = vector.load %arg7[%c0_20, %c0_21, %c0_22] : memref<1x8x64xf32, #tpu.memory_space<vmem>>, vector<1x8x64xf32>
    %24 = vector.shape_cast %23 : vector<1x8x64xf32> to vector<8x64xf32>
    %25 = vector.shape_cast %22 : vector<8x64xf32> to vector<1x8x64xf32>
    tpu.vector_store %arg7[%c0_20, %c0_21, %c0_22], %25 {strides = array<i32>} : memref<1x8x64xf32, #tpu.memory_space<vmem>>, vector<1x8x64xf32>,
    return
  }
  func.func @transform_0(%arg0: i32, %arg1: i32) -> (i32, i32, i32) {
    %c0_i32 = arith.constant 0 : i32
    %c0_i32_0 = arith.constant 0 : i32
    return %arg0, %arg1, %c0_i32 : i32, i32, i32
  }
  func.func @transform_1(%arg0: i32, %arg1: i32) -> (i32, i32) {
    %c0_i32 = arith.constant 0 : i32
    %c0_i32_0 = arith.constant 0 : i32
    %c0_i32_1 = arith.constant 0 : i32
    return %c0_i32, %c0_i32_0 : i32, i32
  }
  func.func @transform_2(%arg0: i32, %arg1: i32) -> (i32, i32) {
    %c0_i32 = arith.constant 0 : i32
    %c0_i32_0 = arith.constant 0 : i32
    %c0_i32_1 = arith.constant 0 : i32
    return %c0_i32, %c0_i32_0 : i32, i32
  }
  func.func @transform_3(%arg0: i32, %arg1: i32) -> (i32, i32, i32) {
    %c0_i32 = arith.constant 0 : i32
    %c0_i32_0 = arith.constant 0 : i32
    return %arg0, %arg1, %c0_i32 : i32, i32, i32
  }
  func.func @transform_4(%arg0: i32, %arg1: i32) -> (i32, i32, i32) {
    %c0_i32 = arith.constant 0 : i32
    %c0_i32_0 = arith.constant 0 : i32
    return %arg0, %arg1, %c0_i32 : i32, i32, i32
  }
  func.func @transform_5(%arg0: i32, %arg1: i32) -> (i32, i32, i32) {
    %c0_i32 = arith.constant 0 : i32
    %c0_i32_0 = arith.constant 0 : i32
    return %arg0, %arg1, %c0_i32 : i32, i32, i32
  }
}

</mosaic_0001>

<bundles_post_ra>
// kernel: tpu_custom_call.1
= control target key start
LH: loop header
LB: loop body
LE: loop exit
PB: predicated region body
PF: predicated region fallthrough
CT: control target
= control target key end

     0   :  { %11 = vsyncpa [#allocation3], 0  ;;  %s1707_s0 = inlined_call_operand.hbm [shape: f32[2,8,64], index: 0, kind: input, shape index: {}]   ;;  %s1708_s1 = inlined_call_operand.hbm [shape: f32[64,192], index: 1, kind: input, shape index: {}]   ;;  %s1709_s2 = inlined_call_operand.hbm [shape: f32[1,192], index: 2, kind: input, shape index: {}]   ;;  %s1710_s3 = inlined_call_operand.hbm [shape: f32[2,8,64], index: 3, kind: output, shape index: {0}]   ;;  %s1711_s4 = inlined_call_operand.hbm [shape: f32[2,8,64], index: 4, kind: output, shape index: {1}]   ;;  %s1712_s5 = inlined_call_operand.hbm [shape: f32[2,8,64], index: 5, kind: output, shape index: {2}]  }
   0x1   :  { %13 = vsyncpa [#allocation3 + $0x1], 0 }
   0x2   :  { %14 = vsyncpa [#allocation6], 0 }
   0x3   :  { %15 = vsyncpa [#allocation4], 0 }
   0x4   :  { %17 = vsyncpa [#allocation4 + $0x1], 0 }
   0x5   :  { %18 = vsyncpa [#allocation10], 0 }
   0x6   :  { %20 = vsyncpa [#allocation10 + $0x1], 0  ;;  %s1362_s18 = smov 0   ;;  %s1364_s19 = smov 0  }
   0x7   :  { %s1366_s20 = smov 0   ;;  %s1368_s21 = smov 0  }
   0x8   :  { %s1370_s22 = smov 0   ;;  %s1372_s23 = smov 0  }
   0x9 LB: > { %s1393_s24 = sadd.s32 4294967295, %s1318_s23   ;;  %s819_s25 = sadd.s32 4294967294, %s1318_s23   ;;  %s1318_s23 = sphi %s1372_s23, %s26_s23   ;;  %s1314_s22 = sphi %s1370_s22, %s1733_s22   ;;  %s1310_s21 = sphi %s1368_s21, %s1732_s21   ;;  %s1306_s20 = sphi %s1366_s20, %s1731_s20   ;;  %s1302_s19 = sphi %s1364_s19, %s1730_s19   ;;  %s1298_s18 = sphi %s1362_s18, %s1729_s18  }
   0xa   : > { %p60_p0 = scmp.ne.s32.totalorder %s1302_s19, %s1298_s18  ;;  %p1713_p1 = scmp.eq.s32.totalorder %s1393_s24, 0 }
   0xb   : > { %p134_p3 = scmp.eq.s32.totalorder %s819_s25, 1  ;;  %p820_p5 = scmp.ge.s32.totalorder %s1318_s23, 1 }
   0xc   : > { %p1404_p4 = por %p1713_p1, %p60_p0  ;;  %p197_p7 = scmp.lt.s32.totalorder %s1318_s23, 3 }
   0xd   : > { %p1409_p6 = por %p134_p3, %p60_p0  ;;  %s1320_s29 = smov [#allocation5]  }
   0xe   : > { %s1716_s26 = scalar_select %p1404_p4, 1, 0 }
   0xf   : > { %s1717_s27 = scalar_select %p1409_p6, 1, 0 }
  0x10   : > { %p1414_p8 = pnand %p820_p5, %p197_p7  ;;  %s209_s30 = sshll.u32 %s1320_s29, 4  ;;  %s1418_s30 = int_to_ptr.vmem [resolvable:$true] %s209_s30 }
  0x11   : > { %s1321_s7 = smov [#allocation7]   ;;  %s1086_s11 = scalar_lea.hbm %s1708_s1, 2048 }
  0x12   : > { %p983_p9 = pneg %p1414_p8  ;;  %s223_s8 = sshll.u32 %s1321_s7, 4  ;;  %s1429_s8 = int_to_ptr.vmem [resolvable:$true] %s223_s8 }
  0x13   : > { %p1087_p12 = scmp.ne.s32.totalorder %s1708_s1, %s1086_s11  ;;  %p1093_p5 = scmp.lt.u32.totalorder %s1086_s11, %s1708_s1 }
  0x14   : > { %p1425_p11 = pnand %p983_p9, %p1713_p1 }
  0x16   : > { %p1088_p13 = pneg %p1425_p11 }
  0x18   : > { %p1089_p0 = pnand %p1088_p13, %p1087_p12 }
  0x1a   : > { %p1090_p3 = pneg %p1089_p0 }
  0x1c   : > { %p1095_p7 = pnand %p1093_p5, %p1090_p3 }
  0x1e   : > { %1098 = shalt.err (!%p1095_p7)
}
  0x1f   : > { %s1099_s16 = scalar_lea.vmem %s1418_s30, 2048  ;;  %p1107_p2 = scmp.lt.s32.totalorder %s1418_s30, %s1418_s30 }
  0x20   : > { %p1100_p9 = scmp.ne.s32.totalorder %s1418_s30, %s1099_s16  ;;  %p1108_p12 = scmp.lt.s32.totalorder %s1099_s16, %s1099_s16 }
  0x22   : > { %p1102_p10 = pnand %p1100_p9, %p1088_p13  ;;  %p1109_p0 = por %p1108_p12, %p1107_p2 }
  0x24   : > { %p1103_p1 = pneg %p1102_p10 }
  0x26   : > { %p1110_p6 = pnand %p1109_p0, %p1103_p1 }
  0x28   : > { %1113 = shalt.err (!%p1110_p6)
}
  0x29   : > { %s1322_s17 = smov 256   ;;  %s1323_s29 = smov 16  }
  0x2a   : > { %986 = dma.hbm_to_vmem [thread:$0]  (!%p1425_p11), %s1708_s1, 2048, %s1418_s30, [#allocation6], %s1322_s17, %s1322_s17, %s1323_s29  }
  0x2b   : > { %s1114_s12 = scalar_lea.hbm %s1709_s2, 32 }
  0x2c   : > { %p1115_p2 = scmp.ne.s32.totalorder %s1709_s2, %s1114_s12  ;;  %p1121_p10 = scmp.lt.u32.totalorder %s1114_s12, %s1709_s2 }
  0x2e   : > { %p1117_p1 = pnand %p1115_p2, %p1088_p13 }
  0x30   : > { %p1118_p6 = pneg %p1117_p1 }
  0x32   : > { %p1123_p3 = pnand %p1121_p10, %p1118_p6 }
  0x34   : > { %1126 = shalt.err (!%p1123_p3)
}
  0x35   : > { %s1127_s30 = scalar_lea.vmem %s1429_s8, 32  ;;  %p1135_p12 = scmp.lt.s32.totalorder %s1429_s8, %s1429_s8 }
  0x36   : > { %p1128_p5 = scmp.ne.s32.totalorder %s1429_s8, %s1127_s30  ;;  %p1136_p0 = scmp.lt.s32.totalorder %s1127_s30, %s1127_s30 }
  0x38   : > { %p1130_p7 = pnand %p1128_p5, %p1088_p13  ;;  %p1137_p2 = por %p1136_p0, %p1135_p12 }
  0x3a   : > { %p1131_p9 = pneg %p1130_p7 }
  0x3c   : > { %p1138_p1 = pnand %p1137_p2, %p1131_p9 }
  0x3e   : > { %1141 = shalt.err (!%p1138_p1)
}
  0x3f   : > { %989 = dma.hbm_to_vmem [thread:$0]  (!%p1425_p11), %s1709_s2, 32, %s1429_s8, [#allocation6]  }
  0x40   : > { %s38_s7 = sadd.s32 1, %s1314_s22  ;;  %s47_s9 = sadd.s32 1, %s1306_s20 }
  0x41   : > { %p40_p13 = scmp.ge.s32.totalorder %s38_s7, 2  ;;  %p54_p6 = scmp.ne.s32.totalorder %s1306_s20, %s1302_s19 }
  0x42   : > { %p55_p10 = scmp.eq.s32.totalorder %s1318_s23, 0  ;;  %p1006_p3 = scmp.lt.s32.totalorder %s1318_s23, 2 }
  0x43   : > { %s1735_s7 = smov (%p40_p13, %s38_s7), 0  ;;  %p1720_p7 = scmp.eq.s32.totalorder %s1393_s24, 1 }
  0x44   : > { %p56_p5 = por %p55_p10, %p54_p6  ;;  %s42_s10 = ssub.s32 %s1314_s22, %s1735_s7 }
  0x45   : > { %p1493_p9 = por %p1720_p7, %p54_p6  ;;  %s234_s11 = sand.u32 1, %s1306_s20  }
  0x46   : > { %p45_p12 = scmp.eq.s32.totalorder %s42_s10, 0  ;;  %s824_s8 = sshll.u32 %s234_s11, 3 }
  0x47   : > { %s1721_s6 = scalar_select %p1493_p9, 1, 0 }
  0x48   : > { %s825_s12 = sshll.u32 %s1314_s22, 7  ;;  %s238_s30 = scalar_lea.vmem [#allocation2], %s824_s8 }
  0x49   : > { %s1502_s13 = scalar_select %p45_p12, %s1306_s20, %s47_s9  }
  0x4a   : > { %s1507_s16 = scalar_lea.hbm %s1707_s0, %s825_s12  ;;  %s246_s17 = sshll.u32 %s238_s30, 4  ;;  %s1515_s17 = int_to_ptr.vmem [resolvable:$true] %s246_s17 }
  0x4b   : > { %p1511_p11 = pnand %p1006_p3, %p56_p5  ;;  %s235_s9 = scalar_lea.sflag [#allocation3], %s234_s11 }
  0x4c   : > { %s1142_s10 = scalar_lea.hbm %s1507_s16, 128  ;;  %s1147_s14 = scalar_lea.hbm %s1707_s0, 256 }
  0x4d   : > { %p1143_p0 = scmp.ne.s32.totalorder %s1507_s16, %s1142_s10  ;;  %p1144_p2 = pneg %p1511_p11 }
  0x4e   : > { %p1148_p6 = scmp.lt.u32.totalorder %s1507_s16, %s1707_s0  ;;  %p1149_p10 = scmp.lt.u32.totalorder %s1147_s14, %s1142_s10 }
  0x4f   : > { %p1145_p1 = pnand %p1144_p2, %p1143_p0  ;;  %p1151_p5 = scmp.lt.u32.totalorder %s1142_s10, %s1507_s16 }
  0x50   : > { %p1150_p3 = por %p1149_p10, %p1148_p6 }
  0x51   : > { %p1146_p13 = pneg %p1145_p1 }
  0x52   : > { %p1152_p7 = por %p1151_p5, %p1150_p3 }
  0x54   : > { %p1153_p12 = pnand %p1152_p7, %p1146_p13 }
  0x56   : > { %1156 = shalt.err (!%p1153_p12)
}
  0x57   : > { %s1157_s11 = scalar_lea.vmem %s1515_s17, 128  ;;  %s1324_s8 = smov [#allocation2]  }
  0x58   : > { %p1158_p0 = scmp.ne.s32.totalorder %s1515_s17, %s1157_s11  ;;  %s1162_s12 = sshll.u32 %s1324_s8, 4  ;;  %s1163_s12 = int_to_ptr.vmem [resolvable:$false] %s1162_s12 }
  0x59   : > { %s1164_s15 = scalar_lea.vmem %s1163_s12, 256  ;;  %p1165_p4 = scmp.lt.s32.totalorder %s1515_s17, %s1163_s12 }
  0x5a   : > { %p1160_p1 = pnand %p1158_p0, %p1144_p2  ;;  %p1166_p6 = scmp.lt.s32.totalorder %s1164_s15, %s1157_s11 }
  0x5c   : > { %p1161_p9 = pneg %p1160_p1  ;;  %p1167_p10 = por %p1166_p6, %p1165_p4 }
  0x5e   : > { %p1168_p3 = pnand %p1167_p10, %p1161_p9 }
  0x60   : > { %1171 = shalt.err (!%p1168_p3)
}
  0x61   : > { %993 = dma.hbm_to_vmem [thread:$0]  (!%p1511_p11), %s1507_s16, 128, %s1515_s17, %s235_s9  }
  0x62   : > { %255 = sbr.rel (%p1414_p8) target bundleno = 496 (0x1f0), region = 32  ;;  %s1545_s10 = sand.u32 (!%p1414_p8), 1, %s1302_s19  }
  0x63   : > { %s1548_s14 = sshll.u32 (!%p1414_p8), %s1545_s10, 3  ;;  %s258_s30 = scalar_lea.sflag (!%p1414_p8), [#allocation3], %s1545_s10 }
  0x64   : > { %s261_s11 = scalar_lea.vmem (!%p1414_p8), [#allocation2], %s1548_s14  ;;  %p1723_p4 = scmp.ne.s32.totalorder (!%p1414_p8), %s1716_s26, 0 }
  0x69   : > { %1281 = dma.done.wait (%p1723_p4), %s258_s30, 128  }
  0x6a   : > { %1283 = vsyncadd (%p1723_p4), %s258_s30, 4294967168  ;;  %p1724_p9 = scmp.eq.s32.totalorder %s1393_s24, 0 }
  0x6c   : > { %1285 = dma.done.wait (%p1724_p9), [#allocation6], 2080   ;;  %p1725_p8 = pmov %p1724_p9 }
  0x6d   : > { %v1325_v0 = vmov 0.0|0.0   ;;  %vm1326_vm0 = vmmov 0   ;;  %v1327_v1 = vmov 0.0   ;;  %v397_v2 = vld [vmem:[#allocation5] sm:$0xff]  ;;  %v398_v3 = vld [vmem:[#allocation5 + $0x10] sm:$0xff]  ;;  %s1328_s26 = smov 64  }
  0x6e   : > { %1287 = vsyncadd (%p1725_p8), [#allocation6], 4294965216  ;;  %931 = vmatprep.subr.bf16.mxu0 %v1325_v0  ;;  %890 = vmatprep.mubr.msk.f32.mxu0 %vm1326_vm0, %v1327_v1  ;;  %v399_v4 = vld [vmem:[#allocation5 + $0x20] sm:$0xff]  ;;  %v1066_v5 = vpack.i.bf16 %v398_v3, %v397_v2  ;;  %v400_v6 = vld [vmem:[#allocation5 + $0x30] sm:$0xff]  ;;  %v932_v9 = vpack.c.bf16 %v398_v3, %v397_v2  ;;  %vm322_vm1 = vcmask 523264   ;;  %s1581_s28 = sshll.u32 %s1310_s21, 7 }
  0x6f   : > { %943 = vmatprep.subr.bf16.mxu1 %v1325_v0  ;;  %909 = vmatprep.mubr.msk.f32.mxu1 %vm1326_vm0, %v1327_v1  ;;  %v401_v7 = vld [vmem:[#allocation5 + $0x40] sm:$0xff]  ;;  %v402_v8 = vld [vmem:[#allocation5 + $0x50] sm:$0xff]  ;;  %v1071_v13 = vpack.i.bf16 %v400_v6, %v399_v4  ;;  %v935_v14 = vpack.c.bf16 %v400_v6, %v399_v4  ;;  %v517_v19 = vld [vmem:[#allocation5 + $0x8] sm:$0xff]  ;;  %s291_s16 = scalar_lea.vmem [#allocation8], %s1548_s14  ;;  %s1588_s8 = scalar_lea.hbm %s1710_s3, %s1581_s28 }
  0x70   : > { %v1076_v10 = vpack.i.bf16 %v402_v8, %v401_v7  ;;  %v403_v11 = vld [vmem:[#allocation5 + $0x60] sm:$0xff]  ;;  %v404_v12 = vld [vmem:[#allocation5 + $0x70] sm:$0xff]  ;;  %1067 = vrot.lane.b32.xlu0 %v1066_v5, %s1328_s26  ;;  %933 = vmatpush3.bf16.msra.mxu0 %v932_v9  ;;  %v938_v16 = vpack.c.bf16 %v402_v8, %v401_v7  ;;  %v518_v20 = vld [vmem:[#allocation5 + $0x18] sm:$0xff]  ;;  %s628_s17 = sshll.u32 %s291_s16, 4  ;;  %s604_s21 = scalar_lea.sflag [#allocation4], %s1545_s10  ;;  %s1590_s17 = int_to_ptr.vmem [resolvable:$true] %s628_s17 }
  0x71   : > { %v1081_v15 = vpack.i.bf16 %v404_v12, %v403_v11  ;;  %934 = vmatprep.subr.bf16.mxu0 %v1325_v0  ;;  %v835_v17 = vld [vmem:[#allocation7] ss:$0 sm:$0xff]  ;;  %v941_v18 = vpack.c.bf16 %v404_v12, %v403_v11  ;;  %v306_v21 = vld [vmem:[%s261_s11] sm:$0xff]  ;;  %v956_v22 = vpack.c.bf16 %v518_v20, %v517_v19  ;;  %v519_v23 = vld [vmem:[#allocation5 + $0x28] sm:$0xff]  ;;  %s1172_s12 = scalar_lea.vmem %s1590_s17, 128  ;;  %p1726_p2 = scmp.ne.s32.totalorder %s1721_s6, 0 }
  0x72   : > { %1077 = vrot.lane.b32.xlu1 %v1076_v10, %s1328_s26  ;;  %v520_v24 = vld [vmem:[#allocation5 + $0x38] sm:$0xff]  ;;  %v521_v26 = vld [vmem:[#allocation5 + $0x48] sm:$0xff]  ;;  %p1173_p11 = scmp.ne.s32.totalorder %s1590_s17, %s1172_s12  ;;  %s1329_s15 = smov [#allocation8]  }
  0x73   : > { %v959_v25 = vpack.c.bf16 %v520_v24, %v519_v23  ;;  %v522_v27 = vld [vmem:[#allocation5 + $0x58] sm:$0xff]  ;;  %v523_v29 = vld [vmem:[#allocation5 + $0x68] sm:$0xff]  ;;  %s1176_s30 = sshll.u32 %s1329_s15, 4  ;;  %s1177_s30 = int_to_ptr.vmem [resolvable:$false] %s1176_s30 }
  0x74   : > { %1072 = vrot.lane.b32.xlu0 %v1071_v13, %s1328_s26  ;;  %936 = vmatpush3.bf16.msra.mxu0 %v935_v14  ;;  %v962_v28 = vpack.c.bf16 %v522_v27, %v521_v26  ;;  %v524_v30 = vld [vmem:[#allocation5 + $0x78] sm:$0xff]  ;;  %p1174_p13 = pnand %p1173_p11, %p1726_p2  ;;  %s1178_s11 = scalar_lea.vmem %s1177_s30, 256 }
  0x75   : > { %937 = vmatprep.subr.bf16.mxu0 %v1325_v0  ;;  %v965_v31 = vpack.c.bf16 %v524_v30, %v523_v29  ;;  %p1179_p7 = scmp.lt.s32.totalorder %s1590_s17, %s1177_s30  ;;  %p1180_p12 = scmp.lt.s32.totalorder %s1178_s11, %s1172_s12 }
  0x76   : > { %1082 = vrot.lane.b32.xlu1 %v1081_v15, %s1328_s26  ;;  %p1175_p5 = pneg %p1174_p13 }
  0x77   : > { %p1181_p0 = por %p1180_p12, %p1179_p7 }
  0x78   : > { %939 = vmatpush3.bf16.msra.mxu0 %v938_v16  ;;  %443 = vrot.lane.b32.xlu0 %v835_v17, %s1328_s26 }
  0x79   : > { %940 = vmatprep.subr.bf16.mxu0 %v1325_v0  ;;  %p1182_p1 = pnand %p1181_p0, %p1175_p5 }
  0x7c   : > { %942 = vmatpush3.bf16.msra.mxu0 %v941_v18 }
  0x7d   : > { %955 = vmatprep.subr.bf16.mxu0 %v1325_v0 }
  0x7f   : > { %891 = vmatmul.mubr.msk.f32.vlgmr.msra.gmra.mrb[0].mxu0 %vm322_vm1, %v306_v21 }
  0x80   : > { %957 = vmatpush3.bf16.msra.mxu0 %v956_v22  ;;  %928 = vmatprep.mubr.msk.f32.mxu0 %vm1326_vm0, %v1327_v1 }
  0x81   : > { %958 = vmatprep.subr.bf16.mxu0 %v1325_v0 }
  0x84   : > { %960 = vmatpush3.bf16.msra.mxu0 %v959_v25 }
  0x85   : > { %961 = vmatprep.subr.bf16.mxu0 %v1325_v0 }
  0x88   : > { %963 = vmatpush3.bf16.msra.mxu0 %v962_v28 }
  0x89   : > { %964 = vmatprep.subr.bf16.mxu0 %v1325_v0 }
  0x8c   : > { %966 = vmatpush3.bf16.msra.mxu0 %v965_v31 }
  0x8f   : > { %929 = vmatmul.mubr.msk.f32.vlgmr.msra.gmra.mrb[2].mxu0 %vm322_vm1, %v306_v21 }
  0xe2   : > { %v1068_v32 = vpop.permute.xlu0 %1067 }
  0xe3   : > { %v1070_v33 = vunpack.i.h.bf16 %v1068_v32  ;;  %v1069_v34 = vunpack.i.l.bf16 %v1068_v32 }
  0xe4   : > { %v1078_v35 = vpop.permute.xlu1 %1077 }
  0xe5   : > { %v944_v36 = vpack.c.bf16 %v1070_v33, %v1069_v34  ;;  %v1080_v40 = vunpack.i.h.bf16 %v1078_v35  ;;  %v1079_v41 = vunpack.i.l.bf16 %v1078_v35 }
  0xe6   : > { %v1073_v37 = vpop.permute.xlu0 %1072 }
  0xe7   : > { %v1075_v38 = vunpack.i.h.bf16 %v1073_v37  ;;  %v1074_v39 = vunpack.i.l.bf16 %v1073_v37  ;;  %945 = vmatpush3.bf16.msra.mxu1 %v944_v36  ;;  %v950_v44 = vpack.c.bf16 %v1080_v40, %v1079_v41 }
  0xe8   : > { %946 = vmatprep.subr.bf16.mxu1 %v1325_v0  ;;  %v1083_v42 = vpop.permute.xlu1 %1082 }
  0xe9   : > { %v947_v43 = vpack.c.bf16 %v1075_v38, %v1074_v39  ;;  %v1085_v45 = vunpack.i.h.bf16 %v1083_v42  ;;  %v1084_v46 = vunpack.i.l.bf16 %v1083_v42 }
  0xeb   : > { %948 = vmatpush3.bf16.msra.mxu1 %v947_v43  ;;  %v953_v47 = vpack.c.bf16 %v1085_v45, %v1084_v46 }
  0xec   : > { %949 = vmatprep.subr.bf16.mxu1 %v1325_v0 }
  0xef   : > { %951 = vmatpush3.bf16.msra.mxu1 %v950_v44 }
  0xf0   : > { %952 = vmatprep.subr.bf16.mxu1 %v1325_v0 }
  0xf3   : > { %954 = vmatpush3.bf16.msra.mxu1 %v953_v47 }
  0xf6   : > { %910 = vmatmul.mubr.msk.f32.vlgmr.msra.gmra.mrb[0].mxu1 %vm322_vm1, %v306_v21 }
 0x152   : > { %v392_v48 = vpop.f32.mrb[0].mxu0 }
 0x153   : > { %v393_v49 = vadd.f32 %v835_v17, %v392_v48  ;;  %v892_v50 = vpop.f32.mrb[1].mxu0 }
 0x155   : > { %396 = vst.msk [vmem:[%s291_s16] sm:$0xff] %vm322_vm1, %v393_v49 }
 0x156   : > { %1185 = shalt.err (!%p1182_p1)
}
 0x157   : > { %s1186_s10 = scalar_lea.hbm %s1588_s8, 128  ;;  %s1190_s29 = scalar_lea.hbm %s1710_s3, 256 }
 0x158   : > { %p1187_p6 = scmp.ne.s32.totalorder %s1588_s8, %s1186_s10  ;;  %p1191_p4 = scmp.lt.u32.totalorder %s1588_s8, %s1710_s3 }
 0x159   : > { %p1192_p9 = scmp.lt.u32.totalorder %s1190_s29, %s1186_s10  ;;  %p1194_p11 = scmp.lt.u32.totalorder %s1186_s10, %s1588_s8 }
 0x15a   : > { %p1188_p10 = pnand %p1187_p6, %p1726_p2 }
 0x15b   : > { %p1193_p8 = por %p1192_p9, %p1191_p4 }
 0x15c   : > { %p1189_p3 = pneg %p1188_p10 }
 0x15d   : > { %p1195_p13 = por %p1194_p11, %p1193_p8 }
 0x15f   : > { %p1196_p5 = pnand %p1195_p13, %p1189_p3 }
 0x161   : > { %1199 = shalt.err (!%p1196_p5)
}
 0x162   : > { %977 = dma.vmem_to_hbm [thread:$0]  (%p1726_p2), %s1590_s17, 128, %s1588_s8, %s604_s21   ;;  %v837_v51 = vld [vmem:[#allocation7 + $0x1] ss:$0 sm:$0xff]  ;;  %v598_v52 = vpop.f32.mrb[2].mxu0  ;;  %v444_v55 = vpop.permute.xlu0 %443 }
 0x163   : > { %v599_v53 = vadd.f32 %v837_v51, %v598_v52  ;;  %v930_v54 = vpop.f32.mrb[3].mxu0  ;;  %s305_s12 = scalar_lea.vmem [#allocation11], %s1548_s14  ;;  %s608_s30 = sand.u32 1, %s1393_s24  }
 0x164   : > { %s298_s11 = scalar_lea.vmem [#allocation9], %s1548_s14  ;;  %s656_s26 = sshll.u32 %s305_s12, 4  ;;  %s1633_s26 = int_to_ptr.vmem [resolvable:$true] %s656_s26 }
 0x165   : > { %602 = vst.msk [vmem:[%s305_s12] sm:$0xff] %vm322_vm1, %v599_v53  ;;  %s642_s10 = sshll.u32 %s298_s11, 4  ;;  %s1623_s17 = scalar_lea.hbm %s1711_s4, %s1581_s28  ;;  %s1625_s10 = int_to_ptr.vmem [resolvable:$true] %s642_s10 }
 0x166   : > { %s1631_s24 = scalar_lea.hbm %s1712_s5, %s1581_s28  ;;  %s1636_s14 = scalar_lea.sflag [#allocation10], %s608_s30 }
 0x167   : > { %s1200_s9 = scalar_lea.vmem %s1625_s10, 128  ;;  %s1330_s15 = smov [#allocation9]  }
 0x168   : > { %p1201_p7 = scmp.ne.s32.totalorder %s1625_s10, %s1200_s9  ;;  %s1204_s12 = sshll.u32 %s1330_s15, 4  ;;  %s1205_s12 = int_to_ptr.vmem [resolvable:$false] %s1204_s12 }
 0x169   : > { %s1206_s16 = scalar_lea.vmem %s1205_s12, 256  ;;  %p1207_p1 = scmp.lt.s32.totalorder %s1625_s10, %s1205_s12 }
 0x16a   : > { %p1202_p12 = pnand %p1201_p7, %p1726_p2  ;;  %p1208_p6 = scmp.lt.s32.totalorder %s1206_s16, %s1200_s9 }
 0x16c   : > { %p1203_p0 = pneg %p1202_p12  ;;  %p1209_p10 = por %p1208_p6, %p1207_p1 }
 0x16e   : > { %p1210_p3 = pnand %p1209_p10, %p1203_p0 }
 0x1c9   : > { %v512_v56 = vpop.f32.mrb[0].mxu1 }
 0x1ca   : > { %v513_v57 = vadd.f32 %v512_v56, %v444_v55  ;;  %v911_v58 = vpop.f32.mrb[1].mxu1 }
 0x1cc   : > { %516 = vst.msk [vmem:[%s298_s11] sm:$0xff] %vm322_vm1, %v513_v57 }
 0x1cd   : > { %1213 = shalt.err (!%p1210_p3)
}
 0x1ce   : > { %s1214_s28 = scalar_lea.hbm %s1623_s17, 128  ;;  %s1218_s29 = scalar_lea.hbm %s1711_s4, 256 }
 0x1cf   : > { %p1215_p4 = scmp.ne.s32.totalorder %s1623_s17, %s1214_s28  ;;  %p1219_p11 = scmp.lt.u32.totalorder %s1623_s17, %s1711_s4 }
 0x1d0   : > { %p1220_p13 = scmp.lt.u32.totalorder %s1218_s29, %s1214_s28  ;;  %p1222_p7 = scmp.lt.u32.totalorder %s1214_s28, %s1623_s17 }
 0x1d1   : > { %p1216_p9 = pnand %p1215_p4, %p1726_p2 }
 0x1d2   : > { %p1221_p5 = por %p1220_p13, %p1219_p11 }
 0x1d3   : > { %p1217_p8 = pneg %p1216_p9 }
 0x1d4   : > { %p1223_p12 = por %p1222_p7, %p1221_p5 }
 0x1d6   : > { %p1224_p0 = pnand %p1223_p12, %p1217_p8 }
 0x1d8   : > { %1227 = shalt.err (!%p1224_p0)
}
 0x1d9   : > { %978 = dma.vmem_to_hbm [thread:$0]  (%p1726_p2), %s1625_s10, 128, %s1623_s17, %s1636_s14  }
 0x1da   : > { %s1228_s9 = scalar_lea.vmem %s1633_s26, 128  ;;  %s1331_s15 = smov [#allocation11]  }
 0x1db   : > { %p1229_p1 = scmp.ne.s32.totalorder %s1633_s26, %s1228_s9  ;;  %s1232_s12 = sshll.u32 %s1331_s15, 4  ;;  %s1233_s12 = int_to_ptr.vmem [resolvable:$false] %s1232_s12 }
 0x1dc   : > { %s1234_s16 = scalar_lea.vmem %s1233_s12, 256  ;;  %p1235_p3 = scmp.lt.s32.totalorder %s1633_s26, %s1233_s12 }
 0x1dd   : > { %p1230_p6 = pnand %p1229_p1, %p1726_p2  ;;  %p1236_p4 = scmp.lt.s32.totalorder %s1234_s16, %s1228_s9 }
 0x1df   : > { %p1231_p10 = pneg %p1230_p6  ;;  %p1237_p9 = por %p1236_p4, %p1235_p3 }
 0x1e1   : > { %p1238_p8 = pnand %p1237_p9, %p1231_p10 }
 0x1e3   : > { %1241 = shalt.err (!%p1238_p8)
}
 0x1e4   : > { %s1242_s10 = scalar_lea.hbm %s1631_s24, 128  ;;  %s1246_s30 = scalar_lea.hbm %s1712_s5, 256 }
 0x1e5   : > { %p1243_p11 = scmp.ne.s32.totalorder %s1631_s24, %s1242_s10  ;;  %p1247_p7 = scmp.lt.u32.totalorder %s1631_s24, %s1712_s5 }
 0x1e6   : > { %p1248_p12 = scmp.lt.u32.totalorder %s1246_s30, %s1242_s10  ;;  %p1250_p1 = scmp.lt.u32.totalorder %s1242_s10, %s1631_s24 }
 0x1e7   : > { %p1244_p13 = pnand %p1243_p11, %p1726_p2 }
 0x1e8   : > { %p1249_p0 = por %p1248_p12, %p1247_p7 }
 0x1e9   : > { %p1245_p5 = pneg %p1244_p13 }
 0x1ea   : > { %p1251_p6 = por %p1250_p1, %p1249_p0 }
 0x1ec   : > { %p1252_p10 = pnand %p1251_p6, %p1245_p5 }
 0x1ee   : > { %1255 = shalt.err (!%p1252_p10)
}
 0x1ef   : > { %979 = dma.vmem_to_hbm [thread:$0]  (%p1726_p2), %s1633_s26, 128, %s1631_s24, %s1636_s14  }
 0x1f0 PF: > { %s668_s8 = sand.u32 1, %s1298_s18   ;;  %p1727_p3 = scmp.ne.s32.totalorder %s1717_s27, 0 }
 0x1f1   : > { %p1728_p4 = scmp.ge.s32.totalorder %s1318_s23, 2  ;;  %s669_s21 = scalar_lea.sflag [#allocation4], %s668_s8 }
 0x1f3   : > { %p995_p9 = pnand %p1728_p4, %p1727_p3 }
 0x1f5   : > { %1289 = dma.done.wait (!%p995_p9), %s669_s21, 128  }
 0x1f6   : > { %1291 = vsyncadd (!%p995_p9), %s669_s21, 4294967168  ;;  %s677_s9 = sand.u32 1, %s819_s25  }
 0x1f7   : > { %s678_s15 = scalar_lea.sflag [#allocation10], %s677_s9 }
 0x1f8   : > { %1293 = dma.done.wait (!%p995_p9), %s678_s15, 256  }
 0x1f9   : > { %1295 = vsyncadd (!%p995_p9), %s678_s15, 4294967040  ;;  %s26_s23 = sadd.s32 1, %s1318_s23   ;;  %s1729_s18 = smov %s1302_s19 }
 0x1fa   : > { %p23_p2 = scmp.ge.s32.totalorder %s26_s23, 4   ;;  %s1730_s19 = smov %s1306_s20 }
 0x1fb   : > { %s1731_s20 = smov %s1502_s13  ;;  %s1732_s21 = smov %s1314_s22 }
 0x1fc   : > { %s1733_s22 = smov %s1735_s7  ;;  %25 = sbr.rel (!%p23_p2) target bundleno = 9 (0x9), region = 117 }
 0x203   :  { %692 = vsyncpa [#allocation3], 1 }
 0x204   :  { %694 = vsyncpa [#allocation3 + $0x1], 1 }
 0x205   :  { %695 = vsyncpa [#allocation6], 1 }
 0x206   :  { %696 = vsyncpa [#allocation4], 1 }
 0x207   :  { %698 = vsyncpa [#allocation4 + $0x1], 1 }
 0x208   :  { %699 = vsyncpa [#allocation10], 1 }
 0x209   :  { %701 = vsyncpa [#allocation10 + $0x1], 1 }

</bundles_post_ra>
